<compile_context>
chip_gen: v7x
topology: tpu7x:2x2x1
jax: 0.10.0
libtpu: 0.0.40
codegen_flags: <defaults>
</compile_context>

<pallas_src>
import jax
import jax.numpy as jnp
from jax.experimental import pallas as pl
from jax.experimental.pallas import tpu as pltpu


def _attention_math(xf, wf):
    # xf, wf: (Bt, S, H) float32. Returns (Bt, H) float32.
    scores = jnp.sum(xf, axis=-1, keepdims=True)       # (Bt, S, 1)  matmul with ones
    m = jnp.max(scores, axis=1, keepdims=True)         # (Bt, 1, 1)
    p = jnp.exp(scores - m)                            # (Bt, S, 1)
    denom = jnp.sum(p, axis=1, keepdims=True)          # (Bt, 1, 1)
    num = jnp.sum(p * wf, axis=1)                      # (Bt, H)
    return num / denom[:, 0, :]                        # normalize once on (Bt, H)


def _soft_attn_kernel_shared(x_ref, o_ref):
    # Default path: weights applied to attention_candidates itself (single DMA).
    xf = x_ref[...].astype(jnp.float32)                # (Bt, S, H)
    o_ref[...] = _attention_math(xf, xf).astype(o_ref.dtype)


def _soft_attn_kernel_two(x_ref, w_ref, o_ref):
    xf = x_ref[...].astype(jnp.float32)                # (Bt, S, H)
    wf = w_ref[...].astype(jnp.float32)                # (Bt, S, H)
    o_ref[...] = _attention_math(xf, wf).astype(o_ref.dtype)


def _choose_batch_tile(B, S, H, itemsize, n_inputs, tile_budget_bytes, max_batch_tile=None):
    """Pick a batch tile Bt and padded batch B_pad (Bt divides B_pad)."""
    # Double-buffered input tiles + an f32 output row per batch element.
    per_row = n_inputs * 2 * S * H * itemsize + 2 * H * 4
    bt_max = max(1, tile_budget_bytes // per_row)
    if max_batch_tile is not None:
        bt_max = min(bt_max, max_batch_tile)
    if B <= bt_max:
        return B, B                                    # single grid step, no padding
    bt = max(8, (bt_max // 8) * 8)                     # multiple of 8 for dense stores
    b_pad = pl.cdiv(B, bt) * bt
    return bt, b_pad


def soft_attention(attention_candidates, attention_size, weighted_sum_candidates=None,
                   max_batch_tile=None):
    """Pallas equivalent of Attention.forward with batch_first=True."""
    B, S, H = attention_candidates.shape
    assert attention_size == H, "attention_size must equal the hidden dim for the matmul to be valid"

    shared = weighted_sum_candidates is None
    n_inputs = 1 if shared else 2
    dtype = attention_candidates.dtype
    itemsize = jnp.dtype(dtype).itemsize

    # Conservative budgets valid on v5e/v6e (128 MiB physical) and v7x (64 MiB physical).
    vmem_limit_bytes = 48 << 20
    tile_budget_bytes = 24 << 20

    Bt, B_pad = _choose_batch_tile(B, S, H, itemsize, n_inputs,
                                   tile_budget_bytes, max_batch_tile)

    args = [attention_candidates]
    if not shared:
        args.append(weighted_sum_candidates)
    if B_pad != B:
        pad_width = ((0, B_pad - B), (0, 0), (0, 0))
        args = [jnp.pad(a, pad_width) for a in args]   # zero rows -> finite, sliced off

    in_spec = pl.BlockSpec((Bt, S, H), lambda b: (b, 0, 0))
    in_specs = [in_spec] * n_inputs
    kernel = _soft_attn_kernel_shared if shared else _soft_attn_kernel_two

    out2d = pl.pallas_call(
        kernel,
        out_shape=jax.ShapeDtypeStruct((B_pad, H), dtype),
        grid_spec=pltpu.PrefetchScalarGridSpec(
            num_scalar_prefetch=0,
            grid=(B_pad // Bt,),
            in_specs=in_specs,
            out_specs=pl.BlockSpec((Bt, H), lambda b: (b, 0)),
        ),
        compiler_params=pltpu.CompilerParams(
            dimension_semantics=("parallel",),
            vmem_limit_bytes=vmem_limit_bytes,
        ),
    )(*args)

    # Free layout plumbing outside the kernel: (B_pad, H) -> (B, 1, H).
    return out2d[:B].reshape(B, 1, H)


def _reference(x, wsc=None):
    # Pure-JAX reference mirroring the PyTorch forward (batch_first=True).
    if wsc is None:
        wsc = x
    scores = jnp.sum(x.astype(jnp.float32), axis=-1, keepdims=True)   # (B, S, 1)
    weights = jax.nn.softmax(scores, axis=1)                          # softmax over seq dim
    out = jnp.sum(weights * wsc.astype(jnp.float32), axis=1, keepdims=True)
    return out.astype(x.dtype)                                        # (B, 1, H)


if __name__ == "__main__":
    key = jax.random.PRNGKey(0)
    k1, k2, k3 = jax.random.split(key, 3)

    B, S, H = 2, 8, 32          # batch=2, seq=8, hidden (= attention_size) = 32
    attention_candidates = jax.random.normal(k1, (B, S, H), dtype=jnp.float32)
    weighted_sum_candidates = jax.random.normal(k2, (B, S, H), dtype=jnp.float32)

    # Path 1: default (weights applied to attention_candidates; single-input kernel).
    out1 = soft_attention(attention_candidates, H)
    jax.block_until_ready(out1)
    ref1 = _reference(attention_candidates)

    # Path 2: explicit weighted_sum_candidates (two-input kernel).
    out2 = soft_attention(attention_candidates, H, weighted_sum_candidates)
    jax.block_until_ready(out2)
    ref2 = _reference(attention_candidates, weighted_sum_candidates)

    # Path 3: exercise the batch-tiled + padded multi-step grid path.
    B3 = 20
    x3 = jax.random.normal(k3, (B3, S, H), dtype=jnp.float32)
    out3 = soft_attention(x3, H, max_batch_tile=8)
    jax.block_until_ready(out3)
    ref3 = _reference(x3)

    assert out1.shape == (B, 1, H) and out2.shape == (B, 1, H) and out3.shape == (B3, 1, H)
    assert jnp.allclose(out1, ref1, atol=1e-5, rtol=1e-5)
    assert jnp.allclose(out2, ref2, atol=1e-5, rtol=1e-5)
    assert jnp.allclose(out3, ref3, atol=1e-5, rtol=1e-5)

    print("KERNEL_OK")
</pallas_src>

<mosaic_0001>
module attributes {stable_mosaic.version = 11 : i64} {
  func.func @_soft_attn_kernel_shared(%arg0: i32, %arg1: memref<2x8x32xf32, #tpu.memory_space<vmem>>, %arg2: memref<2x32xf32, #tpu.memory_space<vmem>>) attributes {dimension_semantics = [#tpu.dimension_semantics<parallel>], iteration_bounds = array<i64: 1>, scalar_prefetch = 0 : i64, scratch_operands = 0 : i64, tpu.core_type = #tpu.core_type<tc>, window_params = [{transform_indices = @transform_0, window_bounds = array<i64: 2, 8, 32>}, {transform_indices = @transform_1, window_bounds = array<i64: 2, 32>}]} {
    %c0 = arith.constant 0 : index
    %c0_0 = arith.constant 0 : index
    %c0_1 = arith.constant 0 : index
    %0 = vector.load %arg1[%c0, %c0_0, %c0_1] : memref<2x8x32xf32, #tpu.memory_space<vmem>>, vector<2x8x32xf32>
    %cst = arith.constant dense<0.000000e+00> : vector<2x8xf32>
    %1 = vector.multi_reduction <add>, %0, %cst [2] : vector<2x8x32xf32> to vector<2x8xf32>
    %2 = vector.shape_cast %1 : vector<2x8xf32> to vector<2x8x1xf32>
    %cst_2 = arith.constant dense<0xFF800000> : vector<2x1xf32>
    %3 = vector.multi_reduction <maximumf>, %2, %cst_2 [1] : vector<2x8x1xf32> to vector<2x1xf32>
    %4 = vector.shape_cast %3 : vector<2x1xf32> to vector<2x1x1xf32>
    %5 = vector.broadcast %4 : vector<2x1x1xf32> to vector<2x8x1xf32>
    %6 = arith.subf %2, %5 : vector<2x8x1xf32>
    %7 = math.exp %6 : vector<2x8x1xf32>
    %cst_3 = arith.constant dense<0.000000e+00> : vector<2x1xf32>
    %8 = vector.multi_reduction <add>, %7, %cst_3 [1] : vector<2x8x1xf32> to vector<2x1xf32>
    %9 = vector.shape_cast %8 : vector<2x1xf32> to vector<2x1x1xf32>
    %10 = vector.broadcast %7 : vector<2x8x1xf32> to vector<2x8x32xf32>
    %11 = arith.mulf %10, %0 : vector<2x8x32xf32>
    %cst_4 = arith.constant dense<0.000000e+00> : vector<2x32xf32>
    %12 = vector.multi_reduction <add>, %11, %cst_4 [1] : vector<2x8x32xf32> to vector<2x32xf32>
    %13 = vector.shape_cast %9 : vector<2x1x1xf32> to vector<2x1xf32>
    %14 = vector.broadcast %13 : vector<2x1xf32> to vector<2x32xf32>
    %15 = arith.divf %12, %14 : vector<2x32xf32>
    %c0_5 = arith.constant 0 : index
    %c0_6 = arith.constant 0 : index
    %16 = vector.load %arg2[%c0_5, %c0_6] : memref<2x32xf32, #tpu.memory_space<vmem>>, vector<2x32xf32>
    tpu.vector_store %arg2[%c0_5, %c0_6], %15 {strides = array<i32>} : memref<2x32xf32, #tpu.memory_space<vmem>>, vector<2x32xf32>,
    return
  }
  func.func @transform_0(%arg0: i32) -> (i32, i32, i32) {
    %c0_i32 = arith.constant 0 : i32
    %c0_i32_0 = arith.constant 0 : i32
    %c0_i32_1 = arith.constant 0 : i32
    return %arg0, %c0_i32, %c0_i32_0 : i32, i32, i32
  }
  func.func @transform_1(%arg0: i32) -> (i32, i32) {
    %c0_i32 = arith.constant 0 : i32
    %c0_i32_0 = arith.constant 0 : i32
    return %arg0, %c0_i32 : i32, i32
  }
}

</mosaic_0001>

<bundles_post_ra>
// kernel: tpu_custom_call.1
= control target key start
LH: loop header
LB: loop body
LE: loop exit
PB: predicated region body
PF: predicated region fallthrough
CT: control target
= control target key end

     0   :  { %6 = vsyncpa [#allocation3], 0  ;;  %s206_s0 = inlined_call_operand.hbm [shape: f32[2,8,32], index: 0, kind: input, shape index: {}]   ;;  %s207_s1 = inlined_call_operand.hbm [shape: f32[2,32], index: 1, kind: output, shape index: {}]  }
   0x1   :  { %7 = vsyncpa [#allocation4], 0  ;;  %s164_s6 = smov [#allocation2]   ;;  %s116_s10 = scalar_lea.hbm %s206_s0, 256 }
   0x2   :  { %s13_s7 = sshll.u32 %s164_s6, 4  ;;  %p117_p0 = scmp.ne.s32.totalorder %s206_s0, %s116_s10  ;;  %s14_s7 = int_to_ptr.vmem [resolvable:$true] %s13_s7 }
   0x3   :  { %p120_p1 = scmp.lt.u32.totalorder %s116_s10, %s206_s0 }
   0x5   :  { %p122_p2 = pnand %p120_p1, %p117_p0 }
   0x7   :  { %125 = shalt.err (!%p122_p2)
}
   0x8   :  { %s126_s15 = scalar_lea.vmem %s14_s7, 256  ;;  %p131_p4 = scmp.lt.s32.totalorder %s14_s7, %s14_s7 }
   0x9   :  { %p127_p3 = scmp.ne.s32.totalorder %s14_s7, %s126_s15  ;;  %p132_p5 = scmp.lt.s32.totalorder %s126_s15, %s126_s15 }
   0xb   :  { %p133_p6 = por %p132_p5, %p131_p4 }
   0xd   :  { %p134_p7 = pnand %p133_p6, %p127_p3 }
   0xf   :  { %137 = shalt.err (!%p134_p7)
}
  0x10   :  { %s165_s16 = smov 128   ;;  %s166_s17 = smov 8  }
  0x11   :  { %19 = dma.hbm_to_vmem [thread:$0]  %s206_s0, 256, %s14_s7, [#allocation3], %s165_s16, %s165_s16, %s166_s17  }
  0x12   :  { %160 = dma.done.wait [#allocation3], 256  }
  0x13   :  { %161 = vsyncadd [#allocation3], 4294967040  ;;  %vm25_vm0 = vcmask 261120   ;;  %v23_v0 = vld [vmem:[#allocation2] sm:$0xff]  ;;  %v24_v1 = vld [vmem:[#allocation2 + $0x8] sm:$0xff]  ;;  %s167_s0 = smov [#allocation5]  }
  0x14   :  { %v26_v2 = vsel %vm25_vm0, %v23_v0, 0.0  ;;  %v29_v3 = vsel %vm25_vm0, %v24_v1, 0.0  ;;  %s95_s20 = sshll.u32 %s167_s0, 4  ;;  %vm84_vm1 = vcmask 1041409   ;;  %vm87_vm2 = vcmask 254976   ;;  %s96_s20 = int_to_ptr.vmem [resolvable:$true] %s95_s20 }
  0x15   :  { %27 = vadd.xlane.f32.xlu0 %v26_v2  ;;  %s138_s21 = scalar_lea.vmem %s96_s20, 32  ;;  %p143_p9 = scmp.lt.s32.totalorder %s96_s20, %s96_s20 }
  0x16   :  { %p139_p8 = scmp.ne.s32.totalorder %s96_s20, %s138_s21  ;;  %p144_p10 = scmp.lt.s32.totalorder %s138_s21, %s138_s21 }
  0x18   :  { %p145_p11 = por %p144_p10, %p143_p9 }
  0x19   :  { %30 = vadd.xlane.f32.xlu0 %v29_v3 }
  0x1a   :  { %p146_p12 = pnand %p145_p11, %p139_p8 }
  0xa2   :  { %v28_v4 = vpop.xlane.xlu0 %27 }
  0xa3   :  { %v32_v5 = vrot.slane %v28_v4, 4 }
  0xa5   :  { %v33_v6 = vmax.f32 %v28_v4, %v32_v5 }
  0xa6   :  { %v31_v7 = vpop.xlane.xlu0 %30 }
  0xa7   :  { %v34_v8 = vrot.slane %v33_v6, 2  ;;  %v38_v9 = vrot.slane %v31_v7, 4 }
  0xa9   :  { %v35_v10 = vmax.f32 %v33_v6, %v34_v8  ;;  %v39_v11 = vmax.f32 %v31_v7, %v38_v9 }
  0xab   :  { %v36_v12 = vrot.slane %v35_v10, 1  ;;  %v40_v13 = vrot.slane %v39_v11, 2 }
  0xad   :  { %v37_v14 = vmax.f32 %v35_v10, %v36_v12  ;;  %v41_v15 = vmax.f32 %v39_v11, %v40_v13 }
  0xaf   :  { %v44_v16 = vsub.f32 %v28_v4, %v37_v14  ;;  %v42_v17 = vrot.slane %v41_v15, 1 }
  0xb1   :  { %v46_v18 = vmul.f32 1.442695, %v44_v16  ;;  %v43_v19 = vmax.f32 %v41_v15, %v42_v17 }
  0xb3   :  { %108 = vpow2.f32 %v46_v18  ;;  %v45_v20 = vsub.f32 %v31_v7, %v43_v19 }
  0xb5   :  { %v48_v21 = vmul.f32 1.442695, %v45_v20 }
  0xb7   :  { %110 = vpow2.f32 %v48_v21 }
  0xbd   :  { %v109_v22 = vpop.eup %108 }
  0xbe   :  { %v50_v23 = vrot.slane %v109_v22, 4  ;;  %v62_v24 = vmul.f32 %v109_v22, %v23_v0 }
  0xc0   :  { %v51_v25 = vadd.f32 %v109_v22, %v50_v23  ;;  %v64_v26 = vsel %vm25_vm0, %v62_v24, 0.0 }
  0xc1   :  { %v111_v27 = vpop.eup %110  ;;  %v65_v31 = vrot.slane %v64_v26, 4 }
  0xc2   :  { %v52_v28 = vrot.slane %v51_v25, 2  ;;  %v56_v29 = vrot.slane %v111_v27, 4  ;;  %v63_v30 = vmul.f32 %v111_v27, %v24_v1 }
  0xc3   :  { %v66_v38 = vadd.f32 %v65_v31, %v64_v26 }
  0xc4   :  { %v53_v32 = vadd.f32 %v52_v28, %v51_v25  ;;  %v57_v33 = vadd.f32 %v111_v27, %v56_v29  ;;  %v71_v34 = vsel %vm25_vm0, %v63_v30, 0.0 }
  0xc5   :  { %v72_v35 = vrot.slane %v71_v34, 4  ;;  %v67_v43 = vrot.slane %v66_v38, 2 }
  0xc6   :  { %v54_v36 = vrot.slane %v53_v32, 1  ;;  %v58_v37 = vrot.slane %v57_v33, 2 }
  0xc7   :  { %v73_v39 = vadd.f32 %v72_v35, %v71_v34  ;;  %v68_v46 = vadd.f32 %v67_v43, %v66_v38 }
  0xc8   :  { %v55_v40 = vadd.f32 %v54_v36, %v53_v32  ;;  %v59_v41 = vadd.f32 %v58_v37, %v57_v33 }
  0xc9   :  { %v74_v44 = vrot.slane %v73_v39, 2  ;;  %v69_v48 = vrot.slane %v68_v46, 1 }
  0xca   :  { %v60_v42 = vrot.slane %v59_v41, 1  ;;  %112 = vrcp.f32 %v55_v40 }
  0xcb   :  { %v75_v47 = vadd.f32 %v74_v44, %v73_v39  ;;  %v70_v51 = vadd.f32 %v69_v48, %v68_v46 }
  0xcc   :  { %v61_v45 = vadd.f32 %v60_v42, %v59_v41 }
  0xcd   :  { %v76_v49 = vrot.slane %v75_v47, 1 }
  0xce   :  { %114 = vrcp.f32 %v61_v45 }
  0xcf   :  { %v77_v52 = vadd.f32 %v76_v49, %v75_v47 }
  0xd4   :  { %v113_v50 = vpop.eup %112 }
  0xd5   :  { %v79_v54 = vmul.f32 %v113_v50, %v70_v51 }
  0xd8   :  { %v115_v53 = vpop.eup %114 }
  0xd9   :  { %v81_v55 = vmul.f32 %v115_v53, %v77_v52 }
  0xdb   :  { %v85_v56 = vsel %vm84_vm1, %v81_v55, %v79_v54 }
  0xdc   :  { %88 = vst.msk [vmem:[#allocation5] sm:$0x3] %vm87_vm2, %v85_v56 }
  0xdd   :  { %149 = shalt.err (!%p146_p12)
}
  0xde   :  { %s150_s24 = scalar_lea.hbm %s207_s1, 32 }
  0xdf   :  { %p151_p13 = scmp.ne.s32.totalorder %s207_s1, %s150_s24  ;;  %p154_p0 = scmp.lt.u32.totalorder %s150_s24, %s207_s1 }
  0xe1   :  { %p156_p1 = pnand %p154_p0, %p151_p13 }
  0xe3   :  { %159 = shalt.err (!%p156_p1)
}
  0xe4   :  { %98 = dma.vmem_to_hbm [thread:$0]  %s96_s20, 32, %s207_s1, [#allocation4]  }
  0xe5   :  { %162 = dma.done.wait [#allocation4], 32  }
  0xe6   :  { %163 = vsyncadd [#allocation4], 4294967264 }
  0xe7   :  { %102 = vsyncpa [#allocation3], 1 }
  0xe8   :  { %103 = vsyncpa [#allocation4], 1 }

</bundles_post_ra>
